<compile_context>
chip_gen: v6e
topology: v6e:2x2x1
jax: 0.10.0
libtpu: 0.0.40
codegen_flags: <defaults>
</compile_context>

<pallas_src>
import jax
import jax.numpy as jnp
from jax import lax
from jax.experimental import pallas as pl
from jax.experimental.pallas import tpu as pltpu

NEG_SLOPE = 0.2


def _round_up(x, m):
    return (x + m - 1) // m * m


def _down_block_kernel(x_ref, w1_ref, h1_ref, w2_ref, h2_ref, sel_ref,
                       pooled_ref, skip_ref, xs_ref, mid_ref):
    # x_ref    : (1, Cin, L)      unpadded input for one batch element (in dtype)
    # w1_ref   : (Cp, K*Cin_p)    conv1 weights, BN scale folded, tap-major (bf16)
    # h1_ref   : (Cp, 1)          conv1 folded bias/BN shift (f32)
    # w2_ref   : (Cp, K*Cp)       conv2 weights, BN scale folded, tap-major (bf16)
    # h2_ref   : (Cp, 1)          conv2 folded bias/BN shift (f32)
    # sel_ref  : (L-1, L//2)      0/1 pool-selection matrix, sel[2j, j] = 1 (bf16)
    # pooled_ref: (1, Cout, L//2) maxpooled output
    # skip_ref : (1, Cout, L)     skip connection output
    # xs_ref   : (Cin_p, Lp)      scratch: zero-padded input (bf16)
    # mid_ref  : (Cp, Lp)         scratch: zero-padded conv1 activations (bf16)
    cin = x_ref.shape[1]
    cout = skip_ref.shape[1]
    L = skip_ref.shape[2]
    cp = w1_ref.shape[0]
    cin_p = xs_ref.shape[0]
    K = w1_ref.shape[1] // cin_p
    pad = K // 2
    cdt = xs_ref.dtype

    # ---- Lane-pad the input inside the kernel (no wrapper-side pad pass). ----
    # Only the two thin pad strips (and the padded channel rows) are zeroed,
    # every step (see header note about why there is no program_id == 0 guard).
    xs_ref[:, :pad] = jnp.zeros((cin_p, pad), cdt)
    xs_ref[:, pad + L:] = jnp.zeros((cin_p, pad), cdt)
    xs_ref[:cin, pad:pad + L] = x_ref[0].astype(cdt)
    if cin_p > cin:  # static at trace time
        xs_ref[cin:, pad:pad + L] = jnp.zeros((cin_p - cin, L), cdt)

    # ---- Conv1d #1: single bf16 MXU matmul, contraction = K*Cin_p ----
    xs = xs_ref[...]
    im2col1 = jnp.concatenate([xs[:, t:t + L] for t in range(K)], axis=0)
    y1 = jnp.dot(w1_ref[...], im2col1, preferred_element_type=jnp.float32)
    y1 = y1 + h1_ref[...]                               # conv bias + eval-BN shift
    y1 = jnp.where(y1 > 0, y1, NEG_SLOPE * y1)          # LeakyReLU(0.2)

    # Stash padded conv1 activations for conv2's im2col.
    mid_ref[:, :pad] = jnp.zeros((cp, pad), cdt)
    mid_ref[:, pad + L:] = jnp.zeros((cp, pad), cdt)
    mid_ref[:, pad:pad + L] = y1.astype(cdt)

    # ---- Conv1d #2: single bf16 MXU matmul, contraction = K*Cp ----
    mid = mid_ref[...]
    im2col2 = jnp.concatenate([mid[:, t:t + L] for t in range(K)], axis=0)
    y2 = jnp.dot(w2_ref[...], im2col2, preferred_element_type=jnp.float32)
    y2 = y2 + h2_ref[...]
    y2 = jnp.where(y2 > 0, y2, NEG_SLOPE * y2)          # (Cp, L) f32

    skip_ref[0] = y2[:cout].astype(skip_ref.dtype)

    # ---- MaxPool1d(kernel=2, stride=2) ----
    # Pairwise max on the VPU over two static lane slices of the live value
    # (m[:, i] = max(y2[:, i], y2[:, i+1])), then ONE bf16 selection matmul
    # against the hoisted 0/1 matrix to pick the even columns
    # (pooled[:, j] = m[:, 2j]).  No per-step iota / f32 matmuls.
    y2c = y2.astype(cdt)
    m = jnp.maximum(y2c[:, :L - 1], y2c[:, 1:])
    pooled = jnp.dot(m, sel_ref[...], preferred_element_type=jnp.float32)
    pooled_ref[0] = pooled[:cout].astype(pooled_ref.dtype)


def down_block(x, params, eps=1e-5, compute_dtype=jnp.bfloat16, out_dtype=None):
    (w1, b1, g1, be1, m1, v1, w2, b2, g2, be2, m2, v2) = params
    N, Cin, L = x.shape
    Cout, _, K = w1.shape
    assert w2.shape[-1] == K, "both convs must share the same kernel size"
    assert K % 2 == 1, "expects odd kernel size ('same' padding)"
    assert L % 2 == 0, "MaxPool1d(2) expects even length"
    if out_dtype is None:
        out_dtype = x.dtype    # pass jnp.bfloat16 to halve the skip writeback
    pad = K // 2
    Lp = L + 2 * pad
    half = L // 2

    # Pad channel counts to multiples of 16 (bf16 sublane tile) so the im2col
    # concatenation stays tile-aligned.  Padded channels are exact zeros.
    ALIGN = 16
    cin_p = _round_up(Cin, ALIGN)
    cp = _round_up(Cout, ALIGN)

    # Fold eval-mode BatchNorm: scale into the conv weights, shift kept.
    sc1 = g1 / jnp.sqrt(v1 + eps)
    sh1 = sc1 * (b1 - m1) + be1
    sc2 = g2 / jnp.sqrt(v2 + eps)
    sh2 = sc2 * (b2 - m2) + be2

    # Conv1 weights -> (Cp, K*Cin_p), tap-major columns (t*cin_p + c).
    w1t = jnp.transpose((sc1[:, None, None] * w1).astype(jnp.float32), (0, 2, 1))
    w1t = jnp.pad(w1t, ((0, cp - Cout), (0, 0), (0, cin_p - Cin)))
    w1f = w1t.reshape(cp, K * cin_p).astype(compute_dtype)

    # Conv2 weights -> (Cp, K*Cp), tap-major columns (t*cp + c).
    w2t = jnp.transpose((sc2[:, None, None] * w2).astype(jnp.float32), (0, 2, 1))
    w2t = jnp.pad(w2t, ((0, cp - Cout), (0, 0), (0, cp - Cout)))
    w2f = w2t.reshape(cp, K * cp).astype(compute_dtype)

    h1 = jnp.pad(sh1, (0, cp - Cout)).reshape(cp, 1).astype(jnp.float32)
    h2 = jnp.pad(sh2, (0, cp - Cout)).reshape(cp, 1).astype(jnp.float32)

    # MaxPool selection matrix, built ONCE in the wrapper (hoisted out of the
    # kernel): sel[2j, j] = 1, shape (L-1, L//2), bf16.
    sel = (jnp.arange(L - 1)[:, None] == 2 * jnp.arange(half)[None, :]
           ).astype(compute_dtype)

    out_isz = jnp.dtype(out_dtype).itemsize
    in_isz = x.dtype.itemsize
    cdt_isz = jnp.dtype(compute_dtype).itemsize

    # Advisory cost estimate for the XLA scheduler.
    flops = 2 * N * L * cp * K * (cin_p + cp) + 2 * N * cp * (L - 1) * half
    bytes_accessed = (N * Cin * L * in_isz
                      + (w1f.size + w2f.size + sel.size) * cdt_isz
                      + (h1.size + h2.size) * 4
                      + N * Cout * (half + L) * out_isz)
    cost = pl.CostEstimate(flops=int(flops), transcendentals=0,
                           bytes_accessed=int(bytes_accessed))

    # Size the scoped VMEM limit from the actual per-step footprint
    # (double-buffered I/O blocks + scratches + im2col / f32 temporaries).
    step_bytes = (2 * Cin * L * in_isz
                  + 2 * (w1f.size + w2f.size + sel.size) * cdt_isz
                  + 2 * (h1.size + h2.size) * 4
                  + 2 * Cout * (half + L) * out_isz
                  + (cin_p + cp) * Lp * cdt_isz            # xs, mid scratch
                  + (K * cin_p + K * cp) * L * cdt_isz     # im2col buffers
                  + 3 * cp * L * 4)                        # y1 / y2 / pool temps
    vmem_limit = int(min(128 * 2 ** 20, max(32 * 2 ** 20, 2 * step_bytes)))

    grid_spec = pltpu.PrefetchScalarGridSpec(
        num_scalar_prefetch=0,
        grid=(N,),
        in_specs=[
            pl.BlockSpec((1, Cin, L), lambda b: (b, 0, 0)),
            pl.BlockSpec((cp, K * cin_p), lambda b: (0, 0)),
            pl.BlockSpec((cp, 1), lambda b: (0, 0)),
            pl.BlockSpec((cp, K * cp), lambda b: (0, 0)),
            pl.BlockSpec((cp, 1), lambda b: (0, 0)),
            pl.BlockSpec((L - 1, half), lambda b: (0, 0)),
        ],
        out_specs=[
            pl.BlockSpec((1, Cout, half), lambda b: (b, 0, 0)),
            pl.BlockSpec((1, Cout, L), lambda b: (b, 0, 0)),
        ],
        scratch_shapes=[
            pltpu.VMEM((cin_p, Lp), compute_dtype),
            pltpu.VMEM((cp, Lp), compute_dtype),
        ],
    )

    pooled, skip = pl.pallas_call(
        _down_block_kernel,
        out_shape=(jax.ShapeDtypeStruct((N, Cout, half), out_dtype),
                   jax.ShapeDtypeStruct((N, Cout, L), out_dtype)),
        grid_spec=grid_spec,
        compiler_params=pltpu.CompilerParams(
            dimension_semantics=("parallel",),
            vmem_limit_bytes=vmem_limit),
        cost_estimate=cost,
    )(x, w1f, h1, w2f, h2, sel)
    return pooled, skip


def ref_forward(x, params, eps=1e-5):
    """Pure-JAX f32 reference of DownBlock.forward (eval-mode BN)."""
    (w1, b1, g1, be1, m1, v1, w2, b2, g2, be2, m2, v2) = params
    pad = w1.shape[-1] // 2
    dn = ('NCH', 'OIH', 'NCH')

    def bn(y, g, be, m, v):
        return (g[None, :, None] * (y - m[None, :, None])
                / jnp.sqrt(v + eps)[None, :, None] + be[None, :, None])

    def lrelu(y):
        return jnp.where(y > 0, y, NEG_SLOPE * y)

    y = lax.conv_general_dilated(x, w1, (1,), [(pad, pad)],
                                 dimension_numbers=dn) + b1[None, :, None]
    y = lrelu(bn(y, g1, be1, m1, v1))
    y = lax.conv_general_dilated(y, w2, (1,), [(pad, pad)],
                                 dimension_numbers=dn) + b2[None, :, None]
    y = lrelu(bn(y, g2, be2, m2, v2))
    skip = y
    N, C, L = y.shape
    pooled = jnp.max(y.reshape(N, C, L // 2, 2), axis=-1)
    return pooled, skip


if __name__ == "__main__":
    N, Cin, Cout, L, K = 2, 4, 8, 16, 15

    keys = jax.random.split(jax.random.PRNGKey(0), 13)
    x = jax.random.normal(keys[0], (N, Cin, L), jnp.float32)

    w1 = 0.1 * jax.random.normal(keys[1], (Cout, Cin, K), jnp.float32)
    b1 = 0.1 * jax.random.normal(keys[2], (Cout,), jnp.float32)
    g1 = 1.0 + 0.1 * jax.random.normal(keys[3], (Cout,), jnp.float32)
    be1 = 0.1 * jax.random.normal(keys[4], (Cout,), jnp.float32)
    m1 = 0.1 * jax.random.normal(keys[5], (Cout,), jnp.float32)
    v1 = jax.random.uniform(keys[6], (Cout,), jnp.float32, 0.5, 1.5)

    w2 = 0.1 * jax.random.normal(keys[7], (Cout, Cout, K), jnp.float32)
    b2 = 0.1 * jax.random.normal(keys[8], (Cout,), jnp.float32)
    g2 = 1.0 + 0.1 * jax.random.normal(keys[9], (Cout,), jnp.float32)
    be2 = 0.1 * jax.random.normal(keys[10], (Cout,), jnp.float32)
    m2 = 0.1 * jax.random.normal(keys[11], (Cout,), jnp.float32)
    v2 = jax.random.uniform(keys[12], (Cout,), jnp.float32, 0.5, 1.5)

    params = (w1, b1, g1, be1, m1, v1, w2, b2, g2, be2, m2, v2)

    pooled, skip = down_block(x, params)
    jax.block_until_ready((pooled, skip))

    pooled_ref, skip_ref = ref_forward(x, params)
    assert pooled.shape == (N, Cout, L // 2) and skip.shape == (N, Cout, L)
    # bf16 conv/pool intermediates vs f32 reference -> loose-ish tolerance.
    assert jnp.allclose(pooled, pooled_ref, atol=5e-2, rtol=5e-2)
    assert jnp.allclose(skip, skip_ref, atol=5e-2, rtol=5e-2)

    print("KERNEL_OK")
</pallas_src>

<mosaic_0001>
module attributes {stable_mosaic.version = 11 : i64} {
  func.func @_down_block_kernel(%arg0: i32, %arg1: memref<1x4x16xf32, #tpu.memory_space<vmem>>, %arg2: memref<16x240xbf16, #tpu.memory_space<vmem>>, %arg3: memref<16x1xf32, #tpu.memory_space<vmem>>, %arg4: memref<16x240xbf16, #tpu.memory_space<vmem>>, %arg5: memref<16x1xf32, #tpu.memory_space<vmem>>, %arg6: memref<15x8xbf16, #tpu.memory_space<vmem>>, %arg7: memref<1x8x8xf32, #tpu.memory_space<vmem>>, %arg8: memref<1x8x16xf32, #tpu.memory_space<vmem>>, %arg9: memref<16x30xbf16, #tpu.memory_space<vmem>>, %arg10: memref<16x30xbf16, #tpu.memory_space<vmem>>) attributes {dimension_semantics = [#tpu.dimension_semantics<parallel>], iteration_bounds = array<i64: 2>, scalar_prefetch = 0 : i64, scratch_operands = 2 : i64, tpu.core_type = #tpu.core_type<tc>, window_params = [{transform_indices = @transform_0, window_bounds = array<i64: 1, 4, 16>}, {pipeline_mode = #tpu.pipeline_mode<synchronous>, transform_indices = @transform_1, window_bounds = array<i64: 16, 240>}, {pipeline_mode = #tpu.pipeline_mode<synchronous>, transform_indices = @transform_2, window_bounds = array<i64: 16, 1>}, {pipeline_mode = #tpu.pipeline_mode<synchronous>, transform_indices = @transform_3, window_bounds = array<i64: 16, 240>}, {pipeline_mode = #tpu.pipeline_mode<synchronous>, transform_indices = @transform_4, window_bounds = array<i64: 16, 1>}, {pipeline_mode = #tpu.pipeline_mode<synchronous>, transform_indices = @transform_5, window_bounds = array<i64: 15, 8>}, {transform_indices = @transform_6, window_bounds = array<i64: 1, 8, 8>}, {transform_indices = @transform_7, window_bounds = array<i64: 1, 8, 16>}]} {
    %cst = arith.constant 0.000000e+00 : bf16
    %0 = vector.broadcast %cst : bf16 to vector<16x7xbf16>
    %c0 = arith.constant 0 : index
    %c0_0 = arith.constant 0 : index
    %1 = vector.load %arg9[%c0, %c0_0] : memref<16x30xbf16, #tpu.memory_space<vmem>>, vector<16x7xbf16>
    tpu.vector_store %arg9[%c0, %c0_0], %0 {strides = array<i32>} : memref<16x30xbf16, #tpu.memory_space<vmem>>, vector<16x7xbf16>,
    %cst_1 = arith.constant 0.000000e+00 : bf16
    %2 = vector.broadcast %cst_1 : bf16 to vector<16x7xbf16>
    %c0_2 = arith.constant 0 : index
    %c23 = arith.constant 23 : index
    %3 = vector.load %arg9[%c0_2, %c23] : memref<16x30xbf16, #tpu.memory_space<vmem>>, vector<16x7xbf16>
    tpu.vector_store %arg9[%c0_2, %c23], %2 {strides = array<i32>} : memref<16x30xbf16, #tpu.memory_space<vmem>>, vector<16x7xbf16>,
    %c0_3 = arith.constant 0 : index
    %c0_4 = arith.constant 0 : index
    %c0_5 = arith.constant 0 : index
    %4 = vector.load %arg1[%c0_3, %c0_4, %c0_5] : memref<1x4x16xf32, #tpu.memory_space<vmem>>, vector<1x4x16xf32>
    %5 = vector.shape_cast %4 : vector<1x4x16xf32> to vector<4x16xf32>
    %6 = arith.truncf %5 : vector<4x16xf32> to vector<4x16xbf16>
    %c0_6 = arith.constant 0 : index
    %c7 = arith.constant 7 : index
    %7 = vector.load %arg9[%c0_6, %c7] : memref<16x30xbf16, #tpu.memory_space<vmem>>, vector<4x16xbf16>
    tpu.vector_store %arg9[%c0_6, %c7], %6 {strides = array<i32>} : memref<16x30xbf16, #tpu.memory_space<vmem>>, vector<4x16xbf16>,
    %cst_7 = arith.constant 0.000000e+00 : bf16
    %8 = vector.broadcast %cst_7 : bf16 to vector<12x16xbf16>
    %c4 = arith.constant 4 : index
    %c7_8 = arith.constant 7 : index
    %9 = vector.load %arg9[%c4, %c7_8] : memref<16x30xbf16, #tpu.memory_space<vmem>>, vector<12x16xbf16>
    tpu.vector_store %arg9[%c4, %c7_8], %8 {strides = array<i32>} : memref<16x30xbf16, #tpu.memory_space<vmem>>, vector<12x16xbf16>,
    %c0_9 = arith.constant 0 : index
    %c0_10 = arith.constant 0 : index
    %10 = vector.load %arg9[%c0_9, %c0_10] : memref<16x30xbf16, #tpu.memory_space<vmem>>, vector<16x30xbf16>
    %11 = vector.extract_strided_slice %10 {offsets = [0, 0], sizes = [16, 16], strides = [1, 1]} : vector<16x30xbf16> to vector<16x16xbf16>
    %12 = vector.extract_strided_slice %10 {offsets = [0, 1], sizes = [16, 16], strides = [1, 1]} : vector<16x30xbf16> to vector<16x16xbf16>
    %13 = vector.extract_strided_slice %10 {offsets = [0, 2], sizes = [16, 16], strides = [1, 1]} : vector<16x30xbf16> to vector<16x16xbf16>
    %14 = vector.extract_strided_slice %10 {offsets = [0, 3], sizes = [16, 16], strides = [1, 1]} : vector<16x30xbf16> to vector<16x16xbf16>
    %15 = vector.extract_strided_slice %10 {offsets = [0, 4], sizes = [16, 16], strides = [1, 1]} : vector<16x30xbf16> to vector<16x16xbf16>
    %16 = vector.extract_strided_slice %10 {offsets = [0, 5], sizes = [16, 16], strides = [1, 1]} : vector<16x30xbf16> to vector<16x16xbf16>
    %17 = vector.extract_strided_slice %10 {offsets = [0, 6], sizes = [16, 16], strides = [1, 1]} : vector<16x30xbf16> to vector<16x16xbf16>
    %18 = vector.extract_strided_slice %10 {offsets = [0, 7], sizes = [16, 16], strides = [1, 1]} : vector<16x30xbf16> to vector<16x16xbf16>
    %19 = vector.extract_strided_slice %10 {offsets = [0, 8], sizes = [16, 16], strides = [1, 1]} : vector<16x30xbf16> to vector<16x16xbf16>
    %20 = vector.extract_strided_slice %10 {offsets = [0, 9], sizes = [16, 16], strides = [1, 1]} : vector<16x30xbf16> to vector<16x16xbf16>
    %21 = vector.extract_strided_slice %10 {offsets = [0, 10], sizes = [16, 16], strides = [1, 1]} : vector<16x30xbf16> to vector<16x16xbf16>
    %22 = vector.extract_strided_slice %10 {offsets = [0, 11], sizes = [16, 16], strides = [1, 1]} : vector<16x30xbf16> to vector<16x16xbf16>
    %23 = vector.extract_strided_slice %10 {offsets = [0, 12], sizes = [16, 16], strides = [1, 1]} : vector<16x30xbf16> to vector<16x16xbf16>
    %24 = vector.extract_strided_slice %10 {offsets = [0, 13], sizes = [16, 16], strides = [1, 1]} : vector<16x30xbf16> to vector<16x16xbf16>
    %25 = vector.extract_strided_slice %10 {offsets = [0, 14], sizes = [16, 16], strides = [1, 1]} : vector<16x30xbf16> to vector<16x16xbf16>
    %26 = tpu.concatenate %11, %12, %13, %14, %15, %16, %17, %18, %19, %20, %21, %22, %23, %24, %25 in 0 : vector<16x16xbf16>, vector<16x16xbf16>, vector<16x16xbf16>, vector<16x16xbf16>, vector<16x16xbf16>, vector<16x16xbf16>, vector<16x16xbf16>, vector<16x16xbf16>, vector<16x16xbf16>, vector<16x16xbf16>, vector<16x16xbf16>, vector<16x16xbf16>, vector<16x16xbf16>, vector<16x16xbf16>, vector<16x16xbf16> -> vector<240x16xbf16>
    %c0_11 = arith.constant 0 : index
    %c0_12 = arith.constant 0 : index
    %27 = vector.load %arg2[%c0_11, %c0_12] : memref<16x240xbf16, #tpu.memory_space<vmem>>, vector<16x240xbf16>
    %cst_13 = arith.constant dense<0.000000e+00> : vector<16x16xf32>
    %28 = tpu.matmul %27, %26, %cst_13 {dimension_numbers = #tpu.dot_dimension_numbers<[1], [0], [0], [1], [0, 0, 1, 1], [], []>} : vector<16x240xbf16>, vector<240x16xbf16>, vector<16x16xf32> -> vector<16x16xf32>
    %c0_14 = arith.constant 0 : index
    %c0_15 = arith.constant 0 : index
    %29 = vector.load %arg3[%c0_14, %c0_15] : memref<16x1xf32, #tpu.memory_space<vmem>>, vector<16x1xf32>
    %30 = vector.broadcast %29 : vector<16x1xf32> to vector<16x16xf32>
    %31 = arith.addf %28, %30 : vector<16x16xf32>
    %cst_16 = arith.constant 0.000000e+00 : f32
    %32 = vector.broadcast %cst_16 : f32 to vector<16x16xf32>
    %33 = arith.cmpf ogt, %31, %32 : vector<16x16xf32>
    %cst_17 = arith.constant 2.000000e-01 : f32
    %34 = vector.broadcast %cst_17 : f32 to vector<16x16xf32>
    %35 = arith.mulf %34, %31 : vector<16x16xf32>
    %36 = arith.select %33, %31, %35 : vector<16x16xi1>, vector<16x16xf32>
    %cst_18 = arith.constant 0.000000e+00 : bf16
    %37 = vector.broadcast %cst_18 : bf16 to vector<16x7xbf16>
    %c0_19 = arith.constant 0 : index
    %c0_20 = arith.constant 0 : index
    %38 = vector.load %arg10[%c0_19, %c0_20] : memref<16x30xbf16, #tpu.memory_space<vmem>>, vector<16x7xbf16>
    tpu.vector_store %arg10[%c0_19, %c0_20], %37 {strides = array<i32>} : memref<16x30xbf16, #tpu.memory_space<vmem>>, vector<16x7xbf16>,
    %cst_21 = arith.constant 0.000000e+00 : bf16
    %39 = vector.broadcast %cst_21 : bf16 to vector<16x7xbf16>
    %c0_22 = arith.constant 0 : index
    %c23_23 = arith.constant 23 : index
    %40 = vector.load %arg10[%c0_22, %c23_23] : memref<16x30xbf16, #tpu.memory_space<vmem>>, vector<16x7xbf16>
    tpu.vector_store %arg10[%c0_22, %c23_23], %39 {strides = array<i32>} : memref<16x30xbf16, #tpu.memory_space<vmem>>, vector<16x7xbf16>,
    %41 = arith.truncf %36 : vector<16x16xf32> to vector<16x16xbf16>
    %c0_24 = arith.constant 0 : index
    %c7_25 = arith.constant 7 : index
    %42 = vector.load %arg10[%c0_24, %c7_25] : memref<16x30xbf16, #tpu.memory_space<vmem>>, vector<16x16xbf16>
    tpu.vector_store %arg10[%c0_24, %c7_25], %41 {strides = array<i32>} : memref<16x30xbf16, #tpu.memory_space<vmem>>, vector<16x16xbf16>,
    %c0_26 = arith.constant 0 : index
    %c0_27 = arith.constant 0 : index
    %43 = vector.load %arg10[%c0_26, %c0_27] : memref<16x30xbf16, #tpu.memory_space<vmem>>, vector<16x30xbf16>
    %44 = vector.extract_strided_slice %43 {offsets = [0, 0], sizes = [16, 16], strides = [1, 1]} : vector<16x30xbf16> to vector<16x16xbf16>
    %45 = vector.extract_strided_slice %43 {offsets = [0, 1], sizes = [16, 16], strides = [1, 1]} : vector<16x30xbf16> to vector<16x16xbf16>
    %46 = vector.extract_strided_slice %43 {offsets = [0, 2], sizes = [16, 16], strides = [1, 1]} : vector<16x30xbf16> to vector<16x16xbf16>
    %47 = vector.extract_strided_slice %43 {offsets = [0, 3], sizes = [16, 16], strides = [1, 1]} : vector<16x30xbf16> to vector<16x16xbf16>
    %48 = vector.extract_strided_slice %43 {offsets = [0, 4], sizes = [16, 16], strides = [1, 1]} : vector<16x30xbf16> to vector<16x16xbf16>
    %49 = vector.extract_strided_slice %43 {offsets = [0, 5], sizes = [16, 16], strides = [1, 1]} : vector<16x30xbf16> to vector<16x16xbf16>
    %50 = vector.extract_strided_slice %43 {offsets = [0, 6], sizes = [16, 16], strides = [1, 1]} : vector<16x30xbf16> to vector<16x16xbf16>
    %51 = vector.extract_strided_slice %43 {offsets = [0, 7], sizes = [16, 16], strides = [1, 1]} : vector<16x30xbf16> to vector<16x16xbf16>
    %52 = vector.extract_strided_slice %43 {offsets = [0, 8], sizes = [16, 16], strides = [1, 1]} : vector<16x30xbf16> to vector<16x16xbf16>
    %53 = vector.extract_strided_slice %43 {offsets = [0, 9], sizes = [16, 16], strides = [1, 1]} : vector<16x30xbf16> to vector<16x16xbf16>
    %54 = vector.extract_strided_slice %43 {offsets = [0, 10], sizes = [16, 16], strides = [1, 1]} : vector<16x30xbf16> to vector<16x16xbf16>
    %55 = vector.extract_strided_slice %43 {offsets = [0, 11], sizes = [16, 16], strides = [1, 1]} : vector<16x30xbf16> to vector<16x16xbf16>
    %56 = vector.extract_strided_slice %43 {offsets = [0, 12], sizes = [16, 16], strides = [1, 1]} : vector<16x30xbf16> to vector<16x16xbf16>
    %57 = vector.extract_strided_slice %43 {offsets = [0, 13], sizes = [16, 16], strides = [1, 1]} : vector<16x30xbf16> to vector<16x16xbf16>
    %58 = vector.extract_strided_slice %43 {offsets = [0, 14], sizes = [16, 16], strides = [1, 1]} : vector<16x30xbf16> to vector<16x16xbf16>
    %59 = tpu.concatenate %44, %45, %46, %47, %48, %49, %50, %51, %52, %53, %54, %55, %56, %57, %58 in 0 : vector<16x16xbf16>, vector<16x16xbf16>, vector<16x16xbf16>, vector<16x16xbf16>, vector<16x16xbf16>, vector<16x16xbf16>, vector<16x16xbf16>, vector<16x16xbf16>, vector<16x16xbf16>, vector<16x16xbf16>, vector<16x16xbf16>, vector<16x16xbf16>, vector<16x16xbf16>, vector<16x16xbf16>, vector<16x16xbf16> -> vector<240x16xbf16>
    %c0_28 = arith.constant 0 : index
    %c0_29 = arith.constant 0 : index
    %60 = vector.load %arg4[%c0_28, %c0_29] : memref<16x240xbf16, #tpu.memory_space<vmem>>, vector<16x240xbf16>
    %cst_30 = arith.constant dense<0.000000e+00> : vector<16x16xf32>
    %61 = tpu.matmul %60, %59, %cst_30 {dimension_numbers = #tpu.dot_dimension_numbers<[1], [0], [0], [1], [0, 0, 1, 1], [], []>} : vector<16x240xbf16>, vector<240x16xbf16>, vector<16x16xf32> -> vector<16x16xf32>
    %c0_31 = arith.constant 0 : index
    %c0_32 = arith.constant 0 : index
    %62 = vector.load %arg5[%c0_31, %c0_32] : memref<16x1xf32, #tpu.memory_space<vmem>>, vector<16x1xf32>
    %63 = vector.broadcast %62 : vector<16x1xf32> to vector<16x16xf32>
    %64 = arith.addf %61, %63 : vector<16x16xf32>
    %cst_33 = arith.constant 0.000000e+00 : f32
    %65 = vector.broadcast %cst_33 : f32 to vector<16x16xf32>
    %66 = arith.cmpf ogt, %64, %65 : vector<16x16xf32>
    %cst_34 = arith.constant 2.000000e-01 : f32
    %67 = vector.broadcast %cst_34 : f32 to vector<16x16xf32>
    %68 = arith.mulf %67, %64 : vector<16x16xf32>
    %69 = arith.select %66, %64, %68 : vector<16x16xi1>, vector<16x16xf32>
    %70 = vector.extract_strided_slice %69 {offsets = [0, 0], sizes = [8, 16], strides = [1, 1]} : vector<16x16xf32> to vector<8x16xf32>
    %c0_35 = arith.constant 0 : index
    %c0_36 = arith.constant 0 : index
    %c0_37 = arith.constant 0 : index
    %71 = vector.load %arg8[%c0_35, %c0_36, %c0_37] : memref<1x8x16xf32, #tpu.memory_space<vmem>>, vector<1x8x16xf32>
    %72 = vector.shape_cast %71 : vector<1x8x16xf32> to vector<8x16xf32>
    %73 = vector.shape_cast %70 : vector<8x16xf32> to vector<1x8x16xf32>
    tpu.vector_store %arg8[%c0_35, %c0_36, %c0_37], %73 {strides = array<i32>} : memref<1x8x16xf32, #tpu.memory_space<vmem>>, vector<1x8x16xf32>,
    %74 = arith.truncf %69 : vector<16x16xf32> to vector<16x16xbf16>
    %75 = vector.extract_strided_slice %74 {offsets = [0, 0], sizes = [16, 15], strides = [1, 1]} : vector<16x16xbf16> to vector<16x15xbf16>
    %76 = vector.extract_strided_slice %74 {offsets = [0, 1], sizes = [16, 15], strides = [1, 1]} : vector<16x16xbf16> to vector<16x15xbf16>
    %77 = arith.maximumf %75, %76 : vector<16x15xbf16>
    %c0_38 = arith.constant 0 : index
    %c0_39 = arith.constant 0 : index
    %78 = vector.load %arg6[%c0_38, %c0_39] : memref<15x8xbf16, #tpu.memory_space<vmem>>, vector<15x8xbf16>
    %cst_40 = arith.constant dense<0.000000e+00> : vector<16x8xf32>
    %79 = tpu.matmul %77, %78, %cst_40 {dimension_numbers = #tpu.dot_dimension_numbers<[1], [0], [0], [1], [0, 0, 1, 1], [], []>} : vector<16x15xbf16>, vector<15x8xbf16>, vector<16x8xf32> -> vector<16x8xf32>
    %80 = vector.extract_strided_slice %79 {offsets = [0, 0], sizes = [8, 8], strides = [1, 1]} : vector<16x8xf32> to vector<8x8xf32>
    %c0_41 = arith.constant 0 : index
    %c0_42 = arith.constant 0 : index
    %c0_43 = arith.constant 0 : index
    %81 = vector.load %arg7[%c0_41, %c0_42, %c0_43] : memref<1x8x8xf32, #tpu.memory_space<vmem>>, vector<1x8x8xf32>
    %82 = vector.shape_cast %81 : vector<1x8x8xf32> to vector<8x8xf32>
    %83 = vector.shape_cast %80 : vector<8x8xf32> to vector<1x8x8xf32>
    tpu.vector_store %arg7[%c0_41, %c0_42, %c0_43], %83 {strides = array<i32>} : memref<1x8x8xf32, #tpu.memory_space<vmem>>, vector<1x8x8xf32>,
    return
  }
  func.func @transform_0(%arg0: i32) -> (i32, i32, i32) {
    %c0_i32 = arith.constant 0 : i32
    %c0_i32_0 = arith.constant 0 : i32
    %c0_i32_1 = arith.constant 0 : i32
    return %arg0, %c0_i32, %c0_i32_0 : i32, i32, i32
  }
  func.func @transform_1(%arg0: i32) -> (i32, i32) {
    %c0_i32 = arith.constant 0 : i32
    %c0_i32_0 = arith.constant 0 : i32
    %c0_i32_1 = arith.constant 0 : i32
    return %c0_i32, %c0_i32_0 : i32, i32
  }
  func.func @transform_2(%arg0: i32) -> (i32, i32) {
    %c0_i32 = arith.constant 0 : i32
    %c0_i32_0 = arith.constant 0 : i32
    %c0_i32_1 = arith.constant 0 : i32
    return %c0_i32, %c0_i32_0 : i32, i32
  }
  func.func @transform_3(%arg0: i32) -> (i32, i32) {
    %c0_i32 = arith.constant 0 : i32
    %c0_i32_0 = arith.constant 0 : i32
    %c0_i32_1 = arith.constant 0 : i32
    return %c0_i32, %c0_i32_0 : i32, i32
  }
  func.func @transform_4(%arg0: i32) -> (i32, i32) {
    %c0_i32 = arith.constant 0 : i32
    %c0_i32_0 = arith.constant 0 : i32
    %c0_i32_1 = arith.constant 0 : i32
    return %c0_i32, %c0_i32_0 : i32, i32
  }
  func.func @transform_5(%arg0: i32) -> (i32, i32) {
    %c0_i32 = arith.constant 0 : i32
    %c0_i32_0 = arith.constant 0 : i32
    %c0_i32_1 = arith.constant 0 : i32
    return %c0_i32, %c0_i32_0 : i32, i32
  }
  func.func @transform_6(%arg0: i32) -> (i32, i32, i32) {
    %c0_i32 = arith.constant 0 : i32
    %c0_i32_0 = arith.constant 0 : i32
    %c0_i32_1 = arith.constant 0 : i32
    return %arg0, %c0_i32, %c0_i32_0 : i32, i32, i32
  }
  func.func @transform_7(%arg0: i32) -> (i32, i32, i32) {
    %c0_i32 = arith.constant 0 : i32
    %c0_i32_0 = arith.constant 0 : i32
    %c0_i32_1 = arith.constant 0 : i32
    return %arg0, %c0_i32, %c0_i32_0 : i32, i32, i32
  }
}

</mosaic_0001>

<bundles_post_ra>
// kernel: tpu_custom_call.1
= control target key start
LH: loop header
LB: loop body
LE: loop exit
PB: predicated region body
PF: predicated region fallthrough
CT: control target
= control target key end

     0   :  { %13 = vsyncpa [#allocation5], 0  ;;  %s1257_s0 = inlined_call_operand.vmem [shape: f32[2,4,16], index: 0, kind: input, shape index: {}]   ;;  %s1258_s1 = inlined_call_operand.vmem [shape: bf16[16,240], index: 1, kind: input, shape index: {}]   ;;  %s1259_s2 = inlined_call_operand.vmem [shape: f32[16,1], index: 2, kind: input, shape index: {}]   ;;  %s1260_s3 = inlined_call_operand.vmem [shape: bf16[16,240], index: 3, kind: input, shape index: {}]   ;;  %s1261_s4 = inlined_call_operand.vmem [shape: f32[16,1], index: 4, kind: input, shape index: {}]   ;;  %s1262_s5 = inlined_call_operand.vmem [shape: bf16[15,8], index: 5, kind: input, shape index: {}]   ;;  %s1263_s6 = inlined_call_operand.hbm [shape: f32[2,8,8], index: 6, kind: output, shape index: {0}]   ;;  %s1264_s7 = inlined_call_operand.hbm [shape: f32[2,8,16], index: 7, kind: output, shape index: {1}]  }
   0x1   :  { %15 = vsyncpa [#allocation5 + $0x1], 0 }
   0x2   :  { %16 = vsyncpa [#allocation7], 0 }
   0x3   :  { %18 = vsyncpa [#allocation7 + $0x1], 0  ;;  %s1024_s24 = smov 0   ;;  %s1026_s25 = smov 0  }
   0x4   :  { %s1028_s26 = smov 0   ;;  %s1030_s27 = smov 0  }
   0x5 LB: > { %s1045_s28 = sadd.s32 4294967295, %s961_s27   ;;  %s762_s29 = sadd.s32 4294967294, %s961_s27   ;;  %s961_s27 = sphi %s1030_s27, %s1289_s27   ;;  %s957_s26 = sphi %s1028_s26, %s1288_s26   ;;  %s953_s25 = sphi %s1026_s25, %s1287_s25   ;;  %s949_s24 = sphi %s1024_s24, %s1286_s24  }
   0x6   : > { %s1049_s30 = sadd.s32 1, %s961_s27   ;;  %s162_s8 = sadd.s32 1, %s957_s26 }
   0x7   : > { %s159_s9 = ssub.s32 %s961_s27, %s1049_s30  ;;  %p172_p0 = scmp.ne.s32.totalorder %s957_s26, %s953_s25 }
   0x8   : > { %p160_p1 = scmp.eq.s32.totalorder %s159_s9, 0  ;;  %p173_p2 = scmp.eq.s32.totalorder %s1045_s28, 1 }
   0x9   : > { %p178_p3 = scmp.ne.s32.totalorder %s953_s25, %s949_s24  ;;  %p179_p4 = scmp.eq.s32.totalorder %s762_s29, 1 }
   0xa   : > { %s1060_s10 = scalar_select %p160_p1, %s957_s26, %s162_s8  }
   0xb   : > { %p1062_p5 = por %p173_p2, %p172_p0  ;;  %p1066_p6 = por %p179_p4, %p178_p3 }
   0xc   : > { %p765_p7 = scmp.ge.s32.totalorder %s961_s27, 1  ;;  %p245_p8 = scmp.lt.s32.totalorder %s961_s27, 3 }
   0xe   : > { %p246_p9 = pnand %p765_p7, %p245_p8 }
   0xf   : > { %p281_p10 = scmp.lt.s32.totalorder (!%p246_p9), %s1045_s28, 1  ;;  %s964_s18 = smov (!%p246_p9), 7  }
  0x10   : > { %249 = sbr.rel (%p246_p9) target bundleno = 1360 (0x550), region = 44  ;;  %s965_s19 = smov (!%p246_p9), 122  }
  0x11   : > { %s966_s20 = smov (!%p246_p9), 121   ;;  %s967_s21 = smov (!%p246_p9), 123  }
  0x12   : > { %s968_s22 = smov (!%p246_p9), 124   ;;  %s1265_s23 = smov (!%p246_p9), 125  }
  0x13   : > { %s1272_s29 = smov (!%p246_p9), 126   ;;  %s1266_s8 = smov (!%p246_p9), 127  }
  0x14   : > { %s1268_s9 = smov (!%p246_p9), 114   ;;  %s1271_s15 = smov (!%p246_p9), 117  }
  0x15   : > { %vm286_vm0 = vcmask 52224   ;;  %vm289_vm1 = vcmask 240824   ;;  %v963_v0 = vmov 0   ;;  %vm302_vm2 = vcmask 183354   ;;  %s282_s13 = scalar_select %p281_p10, %s1045_s28, 1  ;;  %v358_v8 = vld [vmem:[%s1259_s2] sm:$0xff] }
  0x16   : > { %287 = vst.msk [vmem:[#allocation2] sm:$0xf] %vm286_vm0, %v963_v0  ;;  %288 = vst.msk [vmem:[#allocation2 + $0x4] sm:$0xf] %vm286_vm0, %v963_v0  ;;  %vm304_vm3 = vcmask 183352   ;;  %383 = vmatprep.subr.bf16.mxu0 %v963_v0  ;;  %862 = vset.pattern.permute.xlu1 %v963_v0  ;;  %vm300_vm4 = vcmask 181304  }
  0x17   : > { %430 = vst.msk [vmem:[#allocation3] sm:$0xf] %vm286_vm0, %v963_v0  ;;  %431 = vst.msk [vmem:[#allocation3 + $0x4] sm:$0xf] %vm286_vm0, %v963_v0  ;;  %863 = vset.pattern.permute.xlu0 %v963_v0  ;;  %524 = vmatprep.subr.bf16.mxu1 %v963_v0  ;;  %s768_s14 = sshll.u32 %s282_s13, 2  ;;  %s1269_s13 = smov 115  }
  0x18   : > { %290 = vst.msk [vmem:[#allocation2] sm:$0xf] %vm289_vm1, %v963_v0  ;;  %291 = vst.msk [vmem:[#allocation2 + $0x4] sm:$0xf] %vm289_vm1, %v963_v0  ;;  %s284_s17 = scalar_lea.vmem %s1257_s0, %s768_s14  ;;  %s1270_s14 = smov 116   ;;  %vm379_vm5 = vcmask 916480  }
  0x19   : > { %432 = vst.msk [vmem:[#allocation3] sm:$0xf] %vm289_vm1, %v963_v0  ;;  %433 = vst.msk [vmem:[#allocation3 + $0x4] sm:$0xf] %vm289_vm1, %v963_v0  ;;  %v292_v1 = vld [vmem:[%s284_s17] sm:$0xf] }
  0x1a   : > { %303 = vst.msk [vmem:[#allocation2] sm:$0xc] %vm302_vm2, %v963_v0  ;;  %v788_v2 = vpack.c.bf16 %v292_v1, %v292_v1  ;;  %s976_s16 = smov 118   ;;  %s977_s17 = smov 119   ;;  %v866_v7 = vld [vmem:[%s1258_s1 + $0x4] ss:$8 sps:$4 sm:$0xff]  }
  0x1b   : > { %305 = vst.msk [vmem:[#allocation2 + $0x4] sm:$0xf] %vm304_vm3, %v963_v0  ;;  %773 = vmatprep.mubr.msk.bf16.mxu0 %vm379_vm5, %v866_v7  ;;  %v359_v9 = vld [vmem:[%s1259_s2 + $0x8] sm:$0xff]  ;;  %v500_v45 = vld [vmem:[%s1261_s4] sm:$0xff]  ;;  %vm590_vm8 = vcmask 1046528   ;;  %vm591_vm9 = vcmask 1047552  }
  0x1c   : > { %297 = vrot.lane.b32.xlu0 %v788_v2, %s964_s18  ;;  %v864_v24 = vld [vmem:[%s1258_s1] ss:$8 sps:$4 sm:$0xff]   ;;  %v869_v46 = vld [vmem:[%s1260_s3 + $0x4] ss:$8 sps:$4 sm:$0xff]   ;;  %v979_v63 = vmov 0.0   ;;  %v980_v1 = vmov 65535  }
  0x1d   : > { %v501_v44 = vld [vmem:[%s1261_s4 + $0x8] sm:$0xff]  ;;  %779 = vmatprep.mubr.msk.bf16.mxu1 %vm379_vm5, %v869_v46  ;;  %v870_v62 = vld [vmem:[%s1262_s5] sm:$0xff]   ;;  %v592_v2 = vsel %vm590_vm8, 4294967295, %v980_v1  ;;  %vm981_vm10 = vmmov 0   ;;  %vm571_vm12 = vcmask 130048   ;;  %vm586_vm14 = vcmask 121856  }
  0x1e   : > { %v867_v61 = vld [vmem:[%s1260_s3] ss:$8 sps:$4 sm:$0xff]  }
  0x22   : > { %v307_v4 = vld [vmem:[#allocation2 + $0x4] sm:$0xf] }
  0x8e   : > { %v298_v3 = vpop.permute.xlu0 %297 }
  0x8f   : > { %301 = vst.msk [vmem:[#allocation2] sm:$0x3] %vm300_vm4, %v298_v3  ;;  %v593_v3 = vsel %vm591_vm9, %v592_v2, 0 }
  0x96   : > { %v306_v5 = vld [vmem:[#allocation2] sm:$0xf] }
  0x97   : > { %v770_v6 = vcombine.low %v306_v5, %v307_v4  ;;  %v595_v4 = vand.u32 %v870_v62, %v593_v3 }
  0x99   : > { %329 = vrot.lane.b32.xlu1 %v770_v6, %s965_s19  ;;  %332 = vrot.lane.b32.xlu0 %v770_v6, %s966_s20 }
  0x9d   : > { %326 = vrot.lane.b32.xlu1 %v770_v6, %s967_s21  ;;  %323 = vrot.lane.b32.xlu0 %v770_v6, %s968_s22 }
  0xa1   : > { %320 = vrot.lane.b32.xlu1 %v770_v6, %s1265_s23  ;;  %317 = vrot.lane.b32.xlu0 %v770_v6, %s1272_s29  ;;  %s978_s23 = smov 120   ;;  %s1282_s29 = smov 115  }
  0xa5   : > { %314 = vrot.lane.b32.xlu1 %v770_v6, %s1266_s8  ;;  %353 = vrot.lane.b32.xlu0 %v770_v6, %s1268_s9  ;;  %s1277_s9 = smov 126  }
  0xa9   : > { %350 = vrot.lane.b32.xlu1 %v770_v6, %s1269_s13  ;;  %347 = vrot.lane.b32.xlu0 %v770_v6, %s1270_s14  ;;  %s1279_s13 = smov 114   ;;  %s1280_s14 = smov 127  }
  0xad   : > { %344 = vrot.lane.b32.xlu1 %v770_v6, %s1271_s15  ;;  %341 = vrot.lane.b32.xlu0 %v770_v6, %s976_s16  ;;  %s1281_s15 = smov 116  }
  0xb1   : > { %338 = vrot.lane.b32.xlu1 %v770_v6, %s977_s17  ;;  %335 = vrot.lane.b32.xlu0 %v770_v6, %s978_s23 }
  0xb5   : > { %362 = vperm.xlu1 %862, %v358_v8   ;;  %367 = vperm.xlu0 %863, %v359_v9  }
 0x10b   : > { %v333_v10 = vpop.permute.xlu0 %332  ;;  %v330_v11 = vpop.permute.xlu1 %329 }
 0x10c   : > { %384 = vmatpush1.bf16.msra.mxu0 %v333_v10 }
 0x10d   : > { %385 = vmatprep.subr.bf16.mxu0 %v963_v0 }
 0x10f   : > { %v327_v12 = vpop.permute.xlu1 %326  ;;  %v324_v13 = vpop.permute.xlu0 %323 }
 0x110   : > { %386 = vmatpush1.bf16.msra.mxu0 %v330_v11 }
 0x111   : > { %387 = vmatprep.subr.bf16.mxu0 %v963_v0 }
 0x113   : > { %v321_v14 = vpop.permute.xlu1 %320  ;;  %v318_v15 = vpop.permute.xlu0 %317 }
 0x114   : > { %388 = vmatpush1.bf16.msra.mxu0 %v327_v12 }
 0x115   : > { %389 = vmatprep.subr.bf16.mxu0 %v963_v0 }
 0x117   : > { %v315_v16 = vpop.permute.xlu1 %314  ;;  %v354_v17 = vpop.permute.xlu0 %353 }
 0x118   : > { %390 = vmatpush1.bf16.msra.mxu0 %v324_v13 }
 0x119   : > { %391 = vmatprep.subr.bf16.mxu0 %v963_v0 }
 0x11b   : > { %v351_v18 = vpop.permute.xlu1 %350  ;;  %v348_v19 = vpop.permute.xlu0 %347 }
 0x11c   : > { %392 = vmatpush1.bf16.msra.mxu0 %v321_v14 }
 0x11d   : > { %393 = vmatprep.subr.bf16.mxu0 %v963_v0 }
 0x11f   : > { %v345_v20 = vpop.permute.xlu1 %344  ;;  %v342_v21 = vpop.permute.xlu0 %341 }
 0x120   : > { %394 = vmatpush1.bf16.msra.mxu0 %v318_v15 }
 0x121   : > { %395 = vmatprep.subr.bf16.mxu0 %v963_v0 }
 0x123   : > { %v339_v22 = vpop.permute.xlu1 %338  ;;  %v336_v23 = vpop.permute.xlu0 %335 }
 0x124   : > { %396 = vmatpush1.bf16.msra.mxu0 %v315_v16 }
 0x125   : > { %397 = vmatprep.subr.bf16.mxu0 %v963_v0 }
 0x128   : > { %398 = vmatpush1.bf16.msra.mxu0 %v770_v6 }
 0x129   : > { %401 = vmatprep.subr.bf16.mxu0 %v963_v0 }
 0x12c   : > { %402 = vmatpush2.bf16.msra.mxu0 %v354_v17 }
 0x12d   : > { %403 = vmatprep.subr.bf16.mxu0 %v963_v0 }
 0x130   : > { %404 = vmatpush2.bf16.msra.mxu0 %v351_v18  ;;  %v363_v25 = vpop.permute.xlu1 %362  ;;  %v368_v29 = vpop.permute.xlu0 %367 }
 0x131   : > { %405 = vmatprep.subr.bf16.mxu0 %v963_v0 }
 0x134   : > { %406 = vmatpush2.bf16.msra.mxu0 %v348_v19 }
 0x135   : > { %407 = vmatprep.subr.bf16.mxu0 %v963_v0 }
 0x138   : > { %408 = vmatpush2.bf16.msra.mxu0 %v345_v20 }
 0x139   : > { %409 = vmatprep.subr.bf16.mxu0 %v963_v0 }
 0x13c   : > { %410 = vmatpush2.bf16.msra.mxu0 %v342_v21 }
 0x13d   : > { %411 = vmatprep.subr.bf16.mxu0 %v963_v0 }
 0x140   : > { %412 = vmatpush2.bf16.msra.mxu0 %v339_v22 }
 0x141   : > { %413 = vmatprep.subr.bf16.mxu0 %v963_v0 }
 0x144   : > { %414 = vmatpush2.bf16.msra.mxu0 %v336_v23 }
 0x145   : > { %793 = vmatprep.subr.bf16.mxu0 %v979_v63 }
 0x147   : > { %416 = vmatmul.mubr.bf16.vlgmr.msra.gmra.mxu0 %v864_v24 }
 0x148   : > { %794 = vmatpush3.bf16.msra.mxu0 %v595_v4  ;;  %795 = vmatprep.mubr.msk.bf16.mxu0 %vm981_vm10, %v979_v63 }
 0x207   : > { %v417_v26 = vpop.f32.mrf.mxu0 }
 0x208   : > { %v418_v27 = vadd.f32 %v417_v26, %v363_v25 }
 0x209   : > { %v419_v28 = vpop.f32.mrf.mxu0 }
 0x20a   : > { %vm424_vm6 = vcmp.gt.f32.partialorder %v418_v27, 0.0  ;;  %v426_v30 = vmul.f32 0.2, %v418_v27 }
 0x20b   : > { %v420_v31 = vpop.f32.mrf.mxu0 }
 0x20c   : > { %v421_v32 = vadd.f32 %v420_v31, %v368_v29  ;;  %v428_v33 = vsel %vm424_vm6, %v418_v27, %v426_v30 }
 0x20d   : > { %v422_v34 = vpop.f32.mrf.mxu0  ;;  %v789_v35 = vpack.c.bf16 %v428_v33, %v428_v33 }
 0x20e   : > { %vm425_vm7 = vcmp.gt.f32.partialorder %v421_v32, 0.0  ;;  %v427_v36 = vmul.f32 0.2, %v421_v32 }
 0x20f   : > { %440 = vrot.lane.b32.xlu1 %v789_v35, %s964_s18 }
 0x210   : > { %v429_v37 = vsel %vm425_vm7, %v421_v32, %v427_v36 }
 0x211   : > { %v790_v38 = vpack.c.bf16 %v429_v37, %v429_v37 }
 0x213   : > { %442 = vrot.lane.b32.xlu1 %v790_v38, %s964_s18  ;;  %s1278_s18 = smov 125  }
 0x281   : > { %v441_v39 = vpop.permute.xlu1 %440 }
 0x282   : > { %446 = vst.msk [vmem:[#allocation3] sm:$0xf] %vm304_vm3, %v441_v39 }
 0x285   : > { %v443_v40 = vpop.permute.xlu1 %442 }
 0x286   : > { %447 = vst.msk [vmem:[#allocation3 + $0x4] sm:$0xf] %vm304_vm3, %v443_v40 }
 0x289   : > { %v448_v41 = vld [vmem:[#allocation3] sm:$0xf] }
 0x28d   : > { %v449_v42 = vld [vmem:[#allocation3 + $0x4] sm:$0xf] }
 0x28e   : > { %v776_v43 = vcombine.low %v448_v41, %v449_v42 }
 0x290   : > { %471 = vrot.lane.b32.xlu1 %v776_v43, %s965_s19  ;;  %474 = vrot.lane.b32.xlu0 %v776_v43, %s966_s20  ;;  %s1283_s19 = smov 117   ;;  %s1273_s20 = sshll.u32 %s1045_s28, 7 }
 0x291   : > { %s669_s8 = scalar_lea.hbm %s1264_s7, %s1273_s20 }
 0x294   : > { %465 = vrot.lane.b32.xlu1 %v776_v43, %s968_s22  ;;  %468 = vrot.lane.b32.xlu0 %v776_v43, %s967_s21 }
 0x298   : > { %459 = vrot.lane.b32.xlu1 %v776_v43, %s1277_s9  ;;  %462 = vrot.lane.b32.xlu0 %v776_v43, %s1278_s18 }
 0x29c   : > { %495 = vrot.lane.b32.xlu1 %v776_v43, %s1279_s13  ;;  %456 = vrot.lane.b32.xlu0 %v776_v43, %s1280_s14 }
 0x2a0   : > { %489 = vrot.lane.b32.xlu1 %v776_v43, %s1281_s15  ;;  %492 = vrot.lane.b32.xlu0 %v776_v43, %s1282_s29  ;;  %s1183_s15 = sand.u32 1, %s953_s25  }
 0x2a1   : > { %s1274_s29 = sshll.u32 %s1183_s15, 3  ;;  %s645_s18 = scalar_lea.sflag [#allocation7], %s1183_s15 }
 0x2a4   : > { %483 = vrot.lane.b32.xlu1 %v776_v43, %s976_s16  ;;  %486 = vrot.lane.b32.xlu0 %v776_v43, %s1283_s19  ;;  %s280_s19 = scalar_lea.vmem [#allocation6], %s1274_s29  ;;  %s982_s16 = smov [#allocation6]  }
 0x2a5   : > { %s671_s9 = sshll.u32 %s280_s19, 4  ;;  %s672_s9 = int_to_ptr.vmem [resolvable:$true] %s671_s9 }
 0x2a8   : > { %477 = vrot.lane.b32.xlu1 %v776_v43, %s978_s23  ;;  %480 = vrot.lane.b32.xlu0 %v776_v43, %s977_s17  ;;  %s871_s23 = scalar_lea.vmem %s672_s9, 128 }
 0x2a9   : > { %p872_p11 = scmp.ne.s32.totalorder %s672_s9, %s871_s23 }
 0x2ab   : > { %p873_p12 = pnand %p872_p11, %p1062_p5 }
 0x2ac   : > { %509 = vperm.xlu1 %862, %v501_v44   ;;  %504 = vperm.xlu0 %863, %v500_v45  }
 0x2ad   : > { %p874_p13 = pneg %p873_p12 }
 0x302   : > { %v475_v47 = vpop.permute.xlu0 %474  ;;  %v472_v48 = vpop.permute.xlu1 %471 }
 0x303   : > { %525 = vmatpush1.bf16.msra.mxu1 %v475_v47 }
 0x304   : > { %526 = vmatprep.subr.bf16.mxu1 %v963_v0 }
 0x306   : > { %v469_v49 = vpop.permute.xlu0 %468  ;;  %v466_v50 = vpop.permute.xlu1 %465 }
 0x307   : > { %527 = vmatpush1.bf16.msra.mxu1 %v472_v48 }
 0x308   : > { %528 = vmatprep.subr.bf16.mxu1 %v963_v0 }
 0x30a   : > { %v463_v51 = vpop.permute.xlu0 %462  ;;  %v460_v52 = vpop.permute.xlu1 %459 }
 0x30b   : > { %529 = vmatpush1.bf16.msra.mxu1 %v469_v49 }
 0x30c   : > { %530 = vmatprep.subr.bf16.mxu1 %v963_v0 }
 0x30e   : > { %v457_v53 = vpop.permute.xlu0 %456  ;;  %v496_v54 = vpop.permute.xlu1 %495 }
 0x30f   : > { %531 = vmatpush1.bf16.msra.mxu1 %v466_v50 }
 0x310   : > { %532 = vmatprep.subr.bf16.mxu1 %v963_v0 }
 0x312   : > { %v493_v55 = vpop.permute.xlu0 %492  ;;  %v490_v56 = vpop.permute.xlu1 %489 }
 0x313   : > { %533 = vmatpush1.bf16.msra.mxu1 %v463_v51 }
 0x314   : > { %534 = vmatprep.subr.bf16.mxu1 %v963_v0 }
 0x316   : > { %v487_v57 = vpop.permute.xlu0 %486  ;;  %v484_v58 = vpop.permute.xlu1 %483 }
 0x317   : > { %535 = vmatpush1.bf16.msra.mxu1 %v460_v52 }
 0x318   : > { %536 = vmatprep.subr.bf16.mxu1 %v963_v0 }
 0x31a   : > { %v481_v59 = vpop.permute.xlu0 %480  ;;  %v478_v60 = vpop.permute.xlu1 %477 }
 0x31b   : > { %537 = vmatpush1.bf16.msra.mxu1 %v457_v53 }
 0x31c   : > { %538 = vmatprep.subr.bf16.mxu1 %v963_v0 }
 0x31f   : > { %539 = vmatpush1.bf16.msra.mxu1 %v776_v43 }
 0x320   : > { %542 = vmatprep.subr.bf16.mxu1 %v963_v0 }
 0x323   : > { %543 = vmatpush2.bf16.msra.mxu1 %v496_v54 }
 0x324   : > { %544 = vmatprep.subr.bf16.mxu1 %v963_v0 }
 0x327   : > { %545 = vmatpush2.bf16.msra.mxu1 %v493_v55  ;;  %v510_v9 = vpop.permute.xlu1 %509 }
 0x328   : > { %546 = vmatprep.subr.bf16.mxu1 %v963_v0 }
 0x32b   : > { %547 = vmatpush2.bf16.msra.mxu1 %v490_v56 }
 0x32c   : > { %548 = vmatprep.subr.bf16.mxu1 %v963_v0 }
 0x32f   : > { %549 = vmatpush2.bf16.msra.mxu1 %v487_v57 }
 0x330   : > { %550 = vmatprep.subr.bf16.mxu1 %v963_v0 }
 0x333   : > { %551 = vmatpush2.bf16.msra.mxu1 %v484_v58 }
 0x334   : > { %552 = vmatprep.subr.bf16.mxu1 %v963_v0 }
 0x337   : > { %553 = vmatpush2.bf16.msra.mxu1 %v481_v59 }
 0x338   : > { %554 = vmatprep.subr.bf16.mxu1 %v963_v0  ;;  %v505_v0 = vpop.permute.xlu0 %504 }
 0x33b   : > { %555 = vmatpush2.bf16.msra.mxu1 %v478_v60 }
 0x33e   : > { %557 = vmatmul.mubr.bf16.vlgmr.msra.gmra.mxu1 %v867_v61 }
 0x3fe   : > { %v558_v5 = vpop.f32.mrf.mxu1 }
 0x3ff   : > { %v559_v6 = vadd.f32 %v558_v5, %v505_v0 }
 0x400   : > { %v560_v7 = vpop.f32.mrf.mxu1 }
 0x401   : > { %vm565_vm11 = vcmp.gt.f32.partialorder %v559_v6, 0.0  ;;  %v567_v8 = vmul.f32 0.2, %v559_v6 }
 0x402   : > { %v561_v10 = vpop.f32.mrf.mxu1 }
 0x403   : > { %v562_v11 = vadd.f32 %v561_v10, %v510_v9  ;;  %v569_v12 = vsel %vm565_vm11, %v559_v6, %v567_v8 }
 0x404   : > { %v563_v13 = vpop.f32.mrf.mxu1  ;;  %572 = vst.msk [vmem:[%s280_s19] sm:$0xff] %vm571_vm12, %v569_v12 }
 0x405   : > { %vm566_vm13 = vcmp.gt.f32.partialorder %v562_v11, 0.0  ;;  %v568_v14 = vmul.f32 0.2, %v562_v11 }
 0x407   : > { %v570_v15 = vsel %vm566_vm13, %v562_v11, %v568_v14 }
 0x408   : > { %v573_v16 = vpack.c.bf16 %v570_v15, %v569_v12 }
 0x40a   : > { %575 = vrot.lane.b32.xlu0 %v573_v16, %s1280_s14  ;;  %s875_s14 = sshll.u32 %s982_s16, 4  ;;  %s876_s14 = int_to_ptr.vmem [resolvable:$false] %s875_s14 }
 0x40b   : > { %s877_s17 = scalar_lea.vmem %s876_s14, 256  ;;  %p878_p0 = scmp.lt.s32.totalorder %s672_s9, %s876_s14 }
 0x40c   : > { %p879_p1 = scmp.lt.s32.totalorder %s877_s17, %s871_s23 }
 0x40e   : > { %p880_p2 = por %p879_p1, %p878_p0 }
 0x410   : > { %p881_p3 = pnand %p880_p2, %p874_p13 }
 0x47c   : > { %v576_v17 = vpop.permute.xlu0 %575 }
 0x47d   : > { %v578_v18 = vmax.bf16 %v576_v17, %v573_v16 }
 0x47f   : > { %796 = vmatmul.mubr.msk.bf16.vlgmr.msra.gmra.mxu0 %vm586_vm14, %v578_v18 }
 0x480   : > { %884 = shalt.err (!%p881_p3)
}
 0x481   : > { %s885_s13 = scalar_lea.hbm %s669_s8, 128  ;;  %s889_s22 = scalar_lea.hbm %s1264_s7, 256 }
 0x482   : > { %p886_p4 = scmp.ne.s32.totalorder %s669_s8, %s885_s13  ;;  %p890_p9 = scmp.lt.s32.totalorder %s669_s8, %s1264_s7 }
 0x483   : > { %p891_p10 = scmp.lt.s32.totalorder %s889_s22, %s885_s13 }
 0x484   : > { %p887_p7 = pnand %p886_p4, %p1062_p5 }
 0x485   : > { %p892_p11 = por %p891_p10, %p890_p9 }
 0x486   : > { %p888_p8 = pneg %p887_p7 }
 0x488   : > { %p893_p12 = pnand %p892_p11, %p888_p8 }
 0x48a   : > { %896 = shalt.err (!%p893_p12)
}
 0x48b   : > { %800 = dma.vmem_to_hbm [thread:$0]  (%p1062_p5), %s672_s9, 128, %s669_s8, %s645_s18   ;;  %vm637_vm15 = vcmask 64512  }
 0x48c   : > { %s1284_s23 = sshll.u32 %s1183_s15, 3  ;;  %s1285_s17 = sshll.u32 %s1045_s28, 7 }
 0x48d   : > { %s273_s16 = scalar_lea.vmem [#allocation4], %s1284_s23  ;;  %s1215_s29 = scalar_lea.hbm %s1263_s6, %s1285_s17 }
 0x48e   : > { %s658_s14 = sshll.u32 %s273_s16, 4  ;;  %s640_s20 = scalar_lea.sflag [#allocation5], %s1183_s15  ;;  %s1217_s14 = int_to_ptr.vmem [resolvable:$true] %s658_s14 }
 0x48f   : > { %s897_s8 = scalar_lea.vmem %s1217_s14, 128  ;;  %s983_s28 = smov [#allocation4]  }
 0x490   : > { %p898_p13 = scmp.ne.s32.totalorder %s1217_s14, %s897_s8  ;;  %s901_s9 = sshll.u32 %s983_s28, 4  ;;  %s902_s9 = int_to_ptr.vmem [resolvable:$false] %s901_s9 }
 0x491   : > { %s903_s18 = scalar_lea.vmem %s902_s9, 256  ;;  %p904_p2 = scmp.lt.s32.totalorder %s1217_s14, %s902_s9 }
 0x492   : > { %p899_p0 = pnand %p898_p13, %p1062_p5  ;;  %p905_p3 = scmp.lt.s32.totalorder %s903_s18, %s897_s8 }
 0x494   : > { %p900_p1 = pneg %p899_p0  ;;  %p906_p4 = por %p905_p3, %p904_p2 }
 0x496   : > { %p907_p7 = pnand %p906_p4, %p900_p1 }
 0x53f   : > { %v631_v19 = vpop.f32.mrf.mxu0 }
 0x540   : > { %638 = vst.msk [vmem:[%s273_s16] sm:$0xff] %vm637_vm15, %v631_v19 }
 0x541   : > { %v797_v20 = vpop.f32.mrf.mxu0 }
 0x542   : > { %910 = shalt.err (!%p907_p7)
}
 0x543   : > { %s911_s13 = scalar_lea.hbm %s1215_s29, 128  ;;  %s915_s23 = scalar_lea.hbm %s1263_s6, 256 }
 0x544   : > { %p912_p8 = scmp.ne.s32.totalorder %s1215_s29, %s911_s13  ;;  %p916_p11 = scmp.lt.s32.totalorder %s1215_s29, %s1263_s6 }
 0x545   : > { %p917_p12 = scmp.lt.s32.totalorder %s915_s23, %s911_s13 }
 0x546   : > { %p913_p9 = pnand %p912_p8, %p1062_p5 }
 0x547   : > { %p918_p13 = por %p917_p12, %p916_p11 }
 0x548   : > { %p914_p10 = pneg %p913_p9 }
 0x54a   : > { %p919_p0 = pnand %p918_p13, %p914_p10 }
 0x54c   : > { %922 = shalt.err (!%p919_p0)
}
 0x54d   : > { %799 = dma.vmem_to_hbm [thread:$0]  (%p1062_p5), %s1217_s14, 128, %s1215_s29, %s640_s20   ;;  %v634_v21 = vpop.f32.mrf.mxu0 }
 0x54f   : > { %v798_v22 = vpop.f32.mrf.mxu0 }
 0x550 PF: > { %p810_p1 = scmp.ge.s32.totalorder %s961_s27, 2  ;;  %s683_s19 = sand.u32 1, %s949_s24  }
 0x551   : > { %s684_s21 = scalar_lea.sflag [#allocation5], %s683_s19 }
 0x552   : > { %p804_p2 = pnand %p810_p1, %p1066_p6 }
 0x554   : > { %p805_p3 = pneg %p804_p2 }
 0x556   : > { %940 = dma.done.wait (%p805_p3), %s684_s21, 128  }
 0x557   : > { %942 = vsyncadd (%p805_p3), %s684_s21, 4294967168  ;;  %s693_s8 = scalar_lea.sflag [#allocation7], %s683_s19 }
 0x558   : > { %944 = dma.done.wait (%p805_p3), %s693_s8, 128  }
 0x559   : > { %946 = vsyncadd (%p805_p3), %s693_s8, 4294967168  ;;  %p21_p5 = scmp.ge.s32.totalorder %s1049_s30, 4   ;;  %s1286_s24 = smov %s953_s25 }
 0x55a   : > { %s1287_s25 = smov %s957_s26  ;;  %s1288_s26 = smov %s1060_s10 }
 0x55b   : > { %s1289_s27 = smov %s1049_s30  ;;  %23 = sbr.rel (!%p21_p5) target bundleno = 5 (0x5), region = 96 }
 0x560   :  { %698 = vsyncpa [#allocation5], 1 }
 0x561   :  { %700 = vsyncpa [#allocation5 + $0x1], 1 }
 0x562   :  { %701 = vsyncpa [#allocation7], 1 }
 0x563   :  { %703 = vsyncpa [#allocation7 + $0x1], 1 }

</bundles_post_ra>
